<compile_context>
chip_gen: v7x
topology: tpu7x:2x2x1
jax: 0.10.0
libtpu: 0.0.40
codegen_flags: <defaults>
</compile_context>

<pallas_src>
import functools

import jax
import jax.numpy as jnp
from jax.experimental import pallas as pl
from jax.experimental.pallas import tpu as pltpu


def posvae_kernel(probs_ref, eps_ref, emb_pre_ref, bias_ref,
                  musig_w_ref, dec1_wz_ref, dec2_w_ref,
                  xxp_ref, musig_ref, z_ref,
                  *, word_dim, hidden, out_dim):
    # Packed bias rows (width = max(word_dim, hidden, 2*out_dim)):
    #   0: W                      (word_dim)
    #   1: b                      (word_dim)
    #   2: W @ enc_w              (hidden)
    #   3: b @ enc_w + enc_b      (hidden)
    #   4: [mu_b | sig_b]         (2*out_dim)
    #   5: dec1_b                 (hidden)
    #   6: dec2_b                 (word_dim)
    w_row   = bias_ref[0:1, :word_dim]
    b_row   = bias_ref[1:2, :word_dim]
    wenc    = bias_ref[2:3, :hidden]
    benc    = bias_ref[3:4, :hidden]
    musig_b = bias_ref[4:5, :2 * out_dim]
    dec1_b  = bias_ref[5:6, :hidden]
    dec2_b  = bias_ref[6:7, :word_dim]

    probs = probs_ref[...]                                  # (tm, 1)

    # X = logits = torch.ger(probs, W) + b   (rank-1, VPU broadcast)
    logits = probs * w_row + b_row                          # (tm, word_dim)

    # Encoder (single layer, so no Dropout): ReLU((logits + emb_stack) @ enc_w + enc_b)
    # with batch-invariant pieces hoisted to the wrapper:
    #   = ReLU(probs*(W@enc_w) + (b@enc_w + enc_b) + (emb@enc_w)[class])
    h = jnp.maximum(probs * wenc + benc + emb_pre_ref[:, :hidden], 0.0)

    # Fused mu | log_sigma head: one (hidden, 2*out_dim) matmul, 128-aligned split.
    musig = (jnp.dot(h, musig_w_ref[...], preferred_element_type=jnp.float32)
             + musig_b)                                     # (tm, 2*out_dim)
    mu = musig[:, :out_dim]
    ls = musig[:, out_dim:]

    # Reparameterization: Z = mu + exp(log_sigma / 2) * eps,  eps ~ U[0,1)
    z = mu + jnp.exp(ls * 0.5) * eps_ref[...]

    # Decoder: ReLU([emb_stack | Z] @ dec1_w + dec1_b) @ dec2_w + dec2_b.
    # The embed half (emb_stack @ dec1_w[:word_dim]) is batch-invariant and
    # precomputed in the wrapper (emb_pre_ref[:, hidden:]); only the Z half
    # hits the MXU here.
    d1 = jnp.maximum(
        emb_pre_ref[:, hidden:]
        + jnp.dot(z, dec1_wz_ref[...], preferred_element_type=jnp.float32)
        + dec1_b, 0.0)
    xp = jnp.dot(d1, dec2_w_ref[...], preferred_element_type=jnp.float32) + dec2_b

    # Packed outputs (fewer writeback DMAs); wrapper slices on 128-lane boundaries.
    xxp_ref[:, :word_dim] = logits
    xxp_ref[:, word_dim:] = xp
    musig_ref[...] = musig
    z_ref[...] = z


def posvae_forward(probs, embed, params, key, *, tm=512):
    """probs: (batch, n_class) f32; embed: (n_class, word_dim) f32; key: PRNG key.

    Returns (X, Xp, mu, log_sigma, Z, eps)."""
    batch, n_class = probs.shape
    word_dim = embed.shape[1]
    hidden = params["enc_b"].shape[-1]
    out_dim = params["mu_b"].shape[-1]
    n = batch * n_class
    assert word_dim % 128 == 0 and hidden % 128 == 0 and out_dim % 128 == 0

    f32 = jnp.float32
    probs_col = probs.reshape(n, 1).astype(f32)
    emb = embed.astype(f32)

    # eps ~ U[0,1), drawn per forward call (matches torch.rand at forward time).
    eps = jax.random.uniform(key, (n, out_dim), f32)

    enc_w = params["enc_w"].astype(f32)
    dec1_w = params["dec1_w"].astype(f32)

    # Batch-invariant hoists (tiny matvecs / (n_class, .) matmuls, O(word_dim*hidden)).
    w_enc = params["W"].astype(f32) @ enc_w                          # (hidden,)
    base_enc = params["b"].astype(f32) @ enc_w + params["enc_b"].astype(f32)
    emb_enc = emb @ enc_w                                            # (n_class, hidden)
    emb_dec1 = emb @ dec1_w[:word_dim, :]                            # (n_class, hidden)
    # Lane-pack and tile to batch: (n, 2*hidden) = [emb@enc_w | emb@dec1_w[:word_dim]]
    emb_pre = jnp.tile(jnp.concatenate([emb_enc, emb_dec1], axis=1), (batch, 1))

    # Pack all bias-like vectors into one (8, maxw) tile -> one DMA.
    maxw = max(word_dim, hidden, 2 * out_dim)

    def row(v):
        v = jnp.asarray(v, f32).reshape(-1)
        return jnp.pad(v, (0, maxw - v.shape[0])).reshape(1, maxw)

    bias_pack = jnp.concatenate(
        [row(params["W"]), row(params["b"]), row(w_enc), row(base_enc),
         row(jnp.concatenate([params["mu_b"], params["sig_b"]])),
         row(params["dec1_b"]), row(params["dec2_b"]),
         jnp.zeros((1, maxw), f32)], axis=0)                         # (8, maxw)

    # Fused mu|sigma weight: (hidden, 2*out_dim); decoder Z-half weight.
    musig_w = jnp.concatenate([params["mu_w"], params["sig_w"]], axis=1).astype(f32)
    dec1_wz = dec1_w[word_dim:, :]
    dec2_w = params["dec2_w"].astype(f32)
    # Scaled-batch option: cast musig_w / dec1_wz / dec2_w to bf16 (keep f32
    # accumulation and f32 elementwise math) to halve weight DMA bytes.

    tm = min(tm, n)
    assert n % tm == 0 and tm % 8 == 0
    grid_rows = n // tm

    kernel = functools.partial(posvae_kernel, word_dim=word_dim,
                               hidden=hidden, out_dim=out_dim)

    def row_spec(w):
        return pl.BlockSpec((tm, w), lambda i: (i, 0))

    def full_spec(shape):
        return pl.BlockSpec(shape, lambda i: (0, 0))

    in_specs = [
        row_spec(1),                    # probs_col
        row_spec(out_dim),              # eps
        row_spec(2 * hidden),           # emb_pre
        full_spec(bias_pack.shape),     # packed bias rows (resident)
        full_spec(musig_w.shape),       # mu|sigma weight (resident)
        full_spec(dec1_wz.shape),       # dec1 Z-half weight (resident)
        full_spec(dec2_w.shape),        # dec2 weight (resident)
    ]
    out_specs = (row_spec(2 * word_dim), row_spec(2 * out_dim), row_spec(out_dim))
    out_shapes = (
        jax.ShapeDtypeStruct((n, 2 * word_dim), f32),   # [X | Xp]
        jax.ShapeDtypeStruct((n, 2 * out_dim), f32),    # [mu | log_sigma]
        jax.ShapeDtypeStruct((n, out_dim), f32),        # Z
    )

    extra = {}
    if grid_rows > 1:
        # Scaled-batch path: parallel row axis uses v7x's second TensorCore.
        extra["compiler_params"] = pltpu.CompilerParams(
            dimension_semantics=("parallel",))

    xxp, musig, z = pl.pallas_call(
        kernel,
        grid=(grid_rows,),
        in_specs=in_specs,
        out_specs=out_specs,
        out_shape=out_shapes,
        **extra,
    )(probs_col, eps, emb_pre, bias_pack, musig_w, dec1_wz, dec2_w)

    X = xxp[:, :word_dim]
    Xp = xxp[:, word_dim:]
    mu = musig[:, :out_dim]
    log_sigma = musig[:, out_dim:]
    return X, Xp, mu, log_sigma, z, eps


def posvae_reference(probs, embed, params, eps):
    """Pure-JAX reference mirroring the PyTorch forward exactly (eps supplied)."""
    batch, n_class = probs.shape
    n = batch * n_class
    p = probs.reshape(-1)
    logits = p[:, None] * params["W"][None, :] + params["b"][None, :]
    embed_stack = jnp.tile(embed, (batch, 1))
    inputs = (logits.reshape(batch, n_class, -1) + embed[None]).reshape(n, -1)
    dot = lambda a, b: jnp.dot(a, b, preferred_element_type=jnp.float32)
    h = jnp.maximum(dot(inputs, params["enc_w"]) + params["enc_b"], 0.0)
    mu = dot(h, params["mu_w"]) + params["mu_b"]
    ls = dot(h, params["sig_w"]) + params["sig_b"]
    z = mu + jnp.exp(ls / 2.0) * eps
    zs = jnp.concatenate([embed_stack, z], axis=1)
    d1 = jnp.maximum(dot(zs, params["dec1_w"]) + params["dec1_b"], 0.0)
    xp = dot(d1, params["dec2_w"]) + params["dec2_b"]
    return logits, xp, mu, ls, z


def init_params(key, word_dim, hidden, out_dim):
    """Deterministic synthetic init. Linear weights stored as [in, out] with
    PyTorch-default U(-1/sqrt(fan_in), 1/sqrt(fan_in))."""
    ks = jax.random.split(key, 12)

    def linear(kw, kb, fan_in, fan_out):
        lim = 1.0 / (fan_in ** 0.5)
        w = jax.random.uniform(kw, (fan_in, fan_out), jnp.float32, -lim, lim)
        b = jax.random.uniform(kb, (fan_out,), jnp.float32, -lim, lim)
        return w, b

    params = {}
    params["W"] = jax.random.uniform(ks[0], (word_dim,), jnp.float32)   # torch.rand
    params["b"] = jax.random.uniform(ks[1], (word_dim,), jnp.float32)   # torch.rand
    params["enc_w"], params["enc_b"] = linear(ks[2], ks[3], word_dim, hidden)
    params["mu_w"], params["mu_b"] = linear(ks[4], ks[5], hidden, out_dim)
    params["sig_w"], params["sig_b"] = linear(ks[6], ks[7], hidden, out_dim)
    params["dec1_w"], params["dec1_b"] = linear(ks[8], ks[9], out_dim + word_dim, hidden)
    params["dec2_w"], params["dec2_b"] = linear(ks[10], ks[11], hidden, word_dim)
    return params


if __name__ == "__main__":
    batch, n_class = 2, 4
    word_dim, hidden, out_dim = 128, 128, 128   # enc_layers='128', dec_layers='128'

    root = jax.random.PRNGKey(0)
    k_par, k_probs, k_emb, k_eps = jax.random.split(root, 4)

    params = init_params(k_par, word_dim, hidden, out_dim)
    probs = jax.nn.softmax(
        jax.random.normal(k_probs, (batch, n_class), jnp.float32), axis=-1)
    embed = jax.random.normal(k_emb, (n_class, word_dim), jnp.float32) * 0.1

    outs = posvae_forward(probs, embed, params, k_eps)
    outs = jax.block_until_ready(outs)
    X, Xp, mu, ls, Z, eps = outs

    refs = posvae_reference(probs, embed, params, eps)
    for name, o, r in zip(("X", "Xp", "mu", "log_sigma", "Z"),
                          (X, Xp, mu, ls, Z), refs):
        assert o.shape == r.shape and o.dtype == r.dtype, f"shape/dtype: {name}"
        assert jnp.allclose(o, r, rtol=1e-2, atol=1e-2), f"mismatch vs reference: {name}"

    print("KERNEL_OK")
</pallas_src>

<mosaic_0001>
module attributes {stable_mosaic.version = 11 : i64} {
  func.func @posvae_kernel(%arg0: i32, %arg1: memref<8x1xf32, #tpu.memory_space<vmem>>, %arg2: memref<8x128xf32, #tpu.memory_space<vmem>>, %arg3: memref<8x256xf32, #tpu.memory_space<vmem>>, %arg4: memref<8x256xf32, #tpu.memory_space<vmem>>, %arg5: memref<128x256xf32, #tpu.memory_space<vmem>>, %arg6: memref<128x128xf32, #tpu.memory_space<vmem>>, %arg7: memref<128x128xf32, #tpu.memory_space<vmem>>, %arg8: memref<8x256xf32, #tpu.memory_space<vmem>>, %arg9: memref<8x256xf32, #tpu.memory_space<vmem>>, %arg10: memref<8x128xf32, #tpu.memory_space<vmem>>) attributes {dimension_semantics = [#tpu.dimension_semantics<arbitrary>], iteration_bounds = array<i64: 1>, scalar_prefetch = 0 : i64, scratch_operands = 0 : i64, tpu.core_type = #tpu.core_type<tc>, window_params = [{transform_indices = @transform_0, window_bounds = array<i64: 8, 1>}, {transform_indices = @transform_1, window_bounds = array<i64: 8, 128>}, {transform_indices = @transform_2, window_bounds = array<i64: 8, 256>}, {pipeline_mode = #tpu.pipeline_mode<synchronous>, transform_indices = @transform_3, window_bounds = array<i64: 8, 256>}, {pipeline_mode = #tpu.pipeline_mode<synchronous>, transform_indices = @transform_4, window_bounds = array<i64: 128, 256>}, {pipeline_mode = #tpu.pipeline_mode<synchronous>, transform_indices = @transform_5, window_bounds = array<i64: 128, 128>}, {pipeline_mode = #tpu.pipeline_mode<synchronous>, transform_indices = @transform_6, window_bounds = array<i64: 128, 128>}, {transform_indices = @transform_7, window_bounds = array<i64: 8, 256>}, {transform_indices = @transform_8, window_bounds = array<i64: 8, 256>}, {transform_indices = @transform_9, window_bounds = array<i64: 8, 128>}]} {
    %c0 = arith.constant 0 : index
    %c0_0 = arith.constant 0 : index
    %0 = vector.load %arg4[%c0, %c0_0] : memref<8x256xf32, #tpu.memory_space<vmem>>, vector<1x128xf32>
    %c1 = arith.constant 1 : index
    %c0_1 = arith.constant 0 : index
    %1 = vector.load %arg4[%c1, %c0_1] : memref<8x256xf32, #tpu.memory_space<vmem>>, vector<1x128xf32>
    %c2 = arith.constant 2 : index
    %c0_2 = arith.constant 0 : index
    %2 = vector.load %arg4[%c2, %c0_2] : memref<8x256xf32, #tpu.memory_space<vmem>>, vector<1x128xf32>
    %c3 = arith.constant 3 : index
    %c0_3 = arith.constant 0 : index
    %3 = vector.load %arg4[%c3, %c0_3] : memref<8x256xf32, #tpu.memory_space<vmem>>, vector<1x128xf32>
    %c4 = arith.constant 4 : index
    %c0_4 = arith.constant 0 : index
    %4 = vector.load %arg4[%c4, %c0_4] : memref<8x256xf32, #tpu.memory_space<vmem>>, vector<1x256xf32>
    %c5 = arith.constant 5 : index
    %c0_5 = arith.constant 0 : index
    %5 = vector.load %arg4[%c5, %c0_5] : memref<8x256xf32, #tpu.memory_space<vmem>>, vector<1x128xf32>
    %c6 = arith.constant 6 : index
    %c0_6 = arith.constant 0 : index
    %6 = vector.load %arg4[%c6, %c0_6] : memref<8x256xf32, #tpu.memory_space<vmem>>, vector<1x128xf32>
    %c0_7 = arith.constant 0 : index
    %c0_8 = arith.constant 0 : index
    %7 = vector.load %arg1[%c0_7, %c0_8] : memref<8x1xf32, #tpu.memory_space<vmem>>, vector<8x1xf32>
    %8 = vector.broadcast %7 : vector<8x1xf32> to vector<8x128xf32>
    %9 = vector.broadcast %0 : vector<1x128xf32> to vector<8x128xf32>
    %10 = arith.mulf %8, %9 : vector<8x128xf32>
    %11 = vector.broadcast %1 : vector<1x128xf32> to vector<8x128xf32>
    %12 = arith.addf %10, %11 : vector<8x128xf32>
    %13 = vector.broadcast %7 : vector<8x1xf32> to vector<8x128xf32>
    %14 = vector.broadcast %2 : vector<1x128xf32> to vector<8x128xf32>
    %15 = arith.mulf %13, %14 : vector<8x128xf32>
    %16 = vector.broadcast %3 : vector<1x128xf32> to vector<8x128xf32>
    %17 = arith.addf %15, %16 : vector<8x128xf32>
    %c0_9 = arith.constant 0 : index
    %c0_10 = arith.constant 0 : index
    %18 = vector.load %arg3[%c0_9, %c0_10] : memref<8x256xf32, #tpu.memory_space<vmem>>, vector<8x128xf32>
    %19 = arith.addf %17, %18 : vector<8x128xf32>
    %cst = arith.constant 0.000000e+00 : f32
    %20 = vector.broadcast %cst : f32 to vector<8x128xf32>
    %21 = arith.maximumf %19, %20 : vector<8x128xf32>
    %c0_11 = arith.constant 0 : index
    %c0_12 = arith.constant 0 : index
    %22 = vector.load %arg5[%c0_11, %c0_12] : memref<128x256xf32, #tpu.memory_space<vmem>>, vector<128x256xf32>
    %cst_13 = arith.constant dense<0.000000e+00> : vector<8x256xf32>
    %23 = tpu.matmul %21, %22, %cst_13 {dimension_numbers = #tpu.dot_dimension_numbers<[1], [0], [0], [1], [0, 0, 1, 1], [], []>} : vector<8x128xf32>, vector<128x256xf32>, vector<8x256xf32> -> vector<8x256xf32>
    %24 = vector.broadcast %4 : vector<1x256xf32> to vector<8x256xf32>
    %25 = arith.addf %23, %24 : vector<8x256xf32>
    %26 = vector.extract_strided_slice %25 {offsets = [0, 0], sizes = [8, 128], strides = [1, 1]} : vector<8x256xf32> to vector<8x128xf32>
    %27 = vector.extract_strided_slice %25 {offsets = [0, 128], sizes = [8, 128], strides = [1, 1]} : vector<8x256xf32> to vector<8x128xf32>
    %cst_14 = arith.constant 5.000000e-01 : f32
    %28 = vector.broadcast %cst_14 : f32 to vector<8x128xf32>
    %29 = arith.mulf %27, %28 : vector<8x128xf32>
    %30 = math.exp %29 : vector<8x128xf32>
    %c0_15 = arith.constant 0 : index
    %c0_16 = arith.constant 0 : index
    %31 = vector.load %arg2[%c0_15, %c0_16] : memref<8x128xf32, #tpu.memory_space<vmem>>, vector<8x128xf32>
    %32 = arith.mulf %30, %31 : vector<8x128xf32>
    %33 = arith.addf %26, %32 : vector<8x128xf32>
    %c0_17 = arith.constant 0 : index
    %c128 = arith.constant 128 : index
    %34 = vector.load %arg3[%c0_17, %c128] : memref<8x256xf32, #tpu.memory_space<vmem>>, vector<8x128xf32>
    %c0_18 = arith.constant 0 : index
    %c0_19 = arith.constant 0 : index
    %35 = vector.load %arg6[%c0_18, %c0_19] : memref<128x128xf32, #tpu.memory_space<vmem>>, vector<128x128xf32>
    %cst_20 = arith.constant dense<0.000000e+00> : vector<8x128xf32>
    %36 = tpu.matmul %33, %35, %cst_20 {dimension_numbers = #tpu.dot_dimension_numbers<[1], [0], [0], [1], [0, 0, 1, 1], [], []>} : vector<8x128xf32>, vector<128x128xf32>, vector<8x128xf32> -> vector<8x128xf32>
    %37 = arith.addf %34, %36 : vector<8x128xf32>
    %38 = vector.broadcast %5 : vector<1x128xf32> to vector<8x128xf32>
    %39 = arith.addf %37, %38 : vector<8x128xf32>
    %cst_21 = arith.constant 0.000000e+00 : f32
    %40 = vector.broadcast %cst_21 : f32 to vector<8x128xf32>
    %41 = arith.maximumf %39, %40 : vector<8x128xf32>
    %c0_22 = arith.constant 0 : index
    %c0_23 = arith.constant 0 : index
    %42 = vector.load %arg7[%c0_22, %c0_23] : memref<128x128xf32, #tpu.memory_space<vmem>>, vector<128x128xf32>
    %cst_24 = arith.constant dense<0.000000e+00> : vector<8x128xf32>
    %43 = tpu.matmul %41, %42, %cst_24 {dimension_numbers = #tpu.dot_dimension_numbers<[1], [0], [0], [1], [0, 0, 1, 1], [], []>} : vector<8x128xf32>, vector<128x128xf32>, vector<8x128xf32> -> vector<8x128xf32>
    %44 = vector.broadcast %6 : vector<1x128xf32> to vector<8x128xf32>
    %45 = arith.addf %43, %44 : vector<8x128xf32>
    %c0_25 = arith.constant 0 : index
    %c0_26 = arith.constant 0 : index
    %46 = vector.load %arg8[%c0_25, %c0_26] : memref<8x256xf32, #tpu.memory_space<vmem>>, vector<8x128xf32>
    tpu.vector_store %arg8[%c0_25, %c0_26], %12 {strides = array<i32>} : memref<8x256xf32, #tpu.memory_space<vmem>>, vector<8x128xf32>,
    %c0_27 = arith.constant 0 : index
    %c128_28 = arith.constant 128 : index
    %47 = vector.load %arg8[%c0_27, %c128_28] : memref<8x256xf32, #tpu.memory_space<vmem>>, vector<8x128xf32>
    tpu.vector_store %arg8[%c0_27, %c128_28], %45 {strides = array<i32>} : memref<8x256xf32, #tpu.memory_space<vmem>>, vector<8x128xf32>,
    %c0_29 = arith.constant 0 : index
    %c0_30 = arith.constant 0 : index
    %48 = vector.load %arg9[%c0_29, %c0_30] : memref<8x256xf32, #tpu.memory_space<vmem>>, vector<8x256xf32>
    tpu.vector_store %arg9[%c0_29, %c0_30], %25 {strides = array<i32>} : memref<8x256xf32, #tpu.memory_space<vmem>>, vector<8x256xf32>,
    %c0_31 = arith.constant 0 : index
    %c0_32 = arith.constant 0 : index
    %49 = vector.load %arg10[%c0_31, %c0_32] : memref<8x128xf32, #tpu.memory_space<vmem>>, vector<8x128xf32>
    tpu.vector_store %arg10[%c0_31, %c0_32], %33 {strides = array<i32>} : memref<8x128xf32, #tpu.memory_space<vmem>>, vector<8x128xf32>,
    return
  }
  func.func @transform_0(%arg0: i32) -> (i32, i32) {
    %c0_i32 = arith.constant 0 : i32
    %c0_i32_0 = arith.constant 0 : i32
    return %arg0, %c0_i32 : i32, i32
  }
  func.func @transform_1(%arg0: i32) -> (i32, i32) {
    %c0_i32 = arith.constant 0 : i32
    %c0_i32_0 = arith.constant 0 : i32
    return %arg0, %c0_i32 : i32, i32
  }
  func.func @transform_2(%arg0: i32) -> (i32, i32) {
    %c0_i32 = arith.constant 0 : i32
    %c0_i32_0 = arith.constant 0 : i32
    return %arg0, %c0_i32 : i32, i32
  }
  func.func @transform_3(%arg0: i32) -> (i32, i32) {
    %c0_i32 = arith.constant 0 : i32
    %c0_i32_0 = arith.constant 0 : i32
    %c0_i32_1 = arith.constant 0 : i32
    return %c0_i32, %c0_i32_0 : i32, i32
  }
  func.func @transform_4(%arg0: i32) -> (i32, i32) {
    %c0_i32 = arith.constant 0 : i32
    %c0_i32_0 = arith.constant 0 : i32
    %c0_i32_1 = arith.constant 0 : i32
    return %c0_i32, %c0_i32_0 : i32, i32
  }
  func.func @transform_5(%arg0: i32) -> (i32, i32) {
    %c0_i32 = arith.constant 0 : i32
    %c0_i32_0 = arith.constant 0 : i32
    %c0_i32_1 = arith.constant 0 : i32
    return %c0_i32, %c0_i32_0 : i32, i32
  }
  func.func @transform_6(%arg0: i32) -> (i32, i32) {
    %c0_i32 = arith.constant 0 : i32
    %c0_i32_0 = arith.constant 0 : i32
    %c0_i32_1 = arith.constant 0 : i32
    return %c0_i32, %c0_i32_0 : i32, i32
  }
  func.func @transform_7(%arg0: i32) -> (i32, i32) {
    %c0_i32 = arith.constant 0 : i32
    %c0_i32_0 = arith.constant 0 : i32
    return %arg0, %c0_i32 : i32, i32
  }
  func.func @transform_8(%arg0: i32) -> (i32, i32) {
    %c0_i32 = arith.constant 0 : i32
    %c0_i32_0 = arith.constant 0 : i32
    return %arg0, %c0_i32 : i32, i32
  }
  func.func @transform_9(%arg0: i32) -> (i32, i32) {
    %c0_i32 = arith.constant 0 : i32
    %c0_i32_0 = arith.constant 0 : i32
    return %arg0, %c0_i32 : i32, i32
  }
}

</mosaic_0001>

<bundles_post_ra>
// kernel: tpu_custom_call.1
= control target key start
LH: loop header
LB: loop body
LE: loop exit
PB: predicated region body
PF: predicated region fallthrough
CT: control target
= control target key end

     0   :  { %15 = vsyncpa [#allocation3], 0  ;;  %s1060_s0 = inlined_call_operand.vmem [shape: f32[8,1], index: 0, kind: input, shape index: {}]   ;;  %s1061_s1 = inlined_call_operand.hbm [shape: f32[8,128], index: 1, kind: input, shape index: {}]   ;;  %s1062_s2 = inlined_call_operand.vmem [shape: f32[8,256], index: 2, kind: input, shape index: {}]   ;;  %s1063_s3 = inlined_call_operand.hbm [shape: f32[8,256], index: 3, kind: input, shape index: {}]   ;;  %s1064_s4 = inlined_call_operand.hbm [shape: f32[128,256], index: 4, kind: input, shape index: {}]   ;;  %s1065_s5 = inlined_call_operand.hbm [shape: f32[128,128], index: 5, kind: input, shape index: {}]   ;;  %s1066_s6 = inlined_call_operand.hbm [shape: f32[128,128], index: 6, kind: input, shape index: {}]   ;;  %s1067_s7 = inlined_call_operand.hbm [shape: f32[8,256], index: 7, kind: output, shape index: {0}]   ;;  %s1068_s8 = inlined_call_operand.hbm [shape: f32[8,256], index: 8, kind: output, shape index: {1}]   ;;  %s1069_s9 = inlined_call_operand.hbm [shape: f32[8,128], index: 9, kind: output, shape index: {2}]  }
   0x1   :  { %16 = vsyncpa [#allocation6], 0 }
   0x2   :  { %17 = vsyncpa [#allocation9], 0 }
   0x3   :  { %18 = vsyncpa [#allocation4], 0 }
   0x4   :  { %19 = vsyncpa [#allocation13], 0  ;;  %s850_s30 = smov [#allocation5]   ;;  %s851_s11 = smov [#allocation8]  }
   0x5   :  { %s40_s10 = sshll.u32 %s850_s30, 4  ;;  %s61_s12 = sshll.u32 %s851_s11, 4  ;;  %s41_s10 = int_to_ptr.vmem [resolvable:$true] %s40_s10  ;;  %s916_s12 = int_to_ptr.vmem [resolvable:$true] %s61_s12 }
   0x6   :  { %s664_s15 = scalar_lea.hbm %s1063_s3, 256 }
   0x7   :  { %p665_p0 = scmp.ne.s32.totalorder %s1063_s3, %s664_s15  ;;  %p668_p1 = scmp.lt.u32.totalorder %s664_s15, %s1063_s3 }
   0x9   :  { %p670_p2 = pnand %p668_p1, %p665_p0 }
   0xb   :  { %673 = shalt.err (!%p670_p2)
}
   0xc   :  { %s674_s20 = scalar_lea.vmem %s41_s10, 256  ;;  %p679_p4 = scmp.lt.s32.totalorder %s41_s10, %s41_s10 }
   0xd   :  { %p675_p3 = scmp.ne.s32.totalorder %s41_s10, %s674_s20  ;;  %p680_p5 = scmp.lt.s32.totalorder %s674_s20, %s674_s20 }
   0xf   :  { %p681_p6 = por %p680_p5, %p679_p4 }
  0x11   :  { %p682_p7 = pnand %p681_p6, %p675_p3 }
  0x13   :  { %685 = shalt.err (!%p682_p7)
}
  0x14   :  { %43 = dma.hbm_to_vmem [thread:$0]  %s1063_s3, 256, %s41_s10, [#allocation6]  }
  0x15   :  { %s686_s25 = scalar_lea.hbm %s1065_s5, 2048 }
  0x16   :  { %p687_p8 = scmp.ne.s32.totalorder %s1065_s5, %s686_s25  ;;  %p690_p9 = scmp.lt.u32.totalorder %s686_s25, %s1065_s5 }
  0x18   :  { %p692_p10 = pnand %p690_p9, %p687_p8 }
  0x1a   :  { %695 = shalt.err (!%p692_p10)
}
  0x1b   :  { %s696_s30 = scalar_lea.vmem %s916_s12, 2048  ;;  %p701_p12 = scmp.lt.s32.totalorder %s916_s12, %s916_s12 }
  0x1c   :  { %p697_p11 = scmp.ne.s32.totalorder %s916_s12, %s696_s30  ;;  %p702_p13 = scmp.lt.s32.totalorder %s696_s30, %s696_s30 }
  0x1e   :  { %p703_p0 = por %p702_p13, %p701_p12 }
  0x20   :  { %p704_p1 = pnand %p703_p0, %p697_p11 }
  0x22   :  { %707 = shalt.err (!%p704_p1)
}
  0x23   :  { %s852_s3 = smov 128   ;;  %s853_s10 = smov 8  }
  0x24   :  { %67 = dma.hbm_to_vmem [thread:$0]  %s1065_s5, 2048, %s916_s12, [#allocation9], %s852_s3, %s852_s3, %s853_s10  }
  0x25   :  { %s854_s14 = smov [#allocation2]   ;;  %s855_s16 = smov [#allocation7]  }
  0x26   :  { %s28_s15 = sshll.u32 %s854_s14, 4  ;;  %s49_s17 = sshll.u32 %s855_s16, 4  ;;  %s29_s15 = int_to_ptr.vmem [resolvable:$true] %s28_s15  ;;  %s950_s17 = int_to_ptr.vmem [resolvable:$true] %s49_s17 }
  0x27   :  { %s708_s20 = scalar_lea.hbm %s1061_s1, 128 }
  0x28   :  { %p709_p2 = scmp.ne.s32.totalorder %s1061_s1, %s708_s20  ;;  %p712_p3 = scmp.lt.u32.totalorder %s708_s20, %s1061_s1 }
  0x2a   :  { %p714_p4 = pnand %p712_p3, %p709_p2 }
  0x2c   :  { %717 = shalt.err (!%p714_p4)
}
  0x2d   :  { %s718_s5 = scalar_lea.vmem %s29_s15, 128  ;;  %p723_p6 = scmp.lt.s32.totalorder %s29_s15, %s29_s15 }
  0x2e   :  { %p719_p5 = scmp.ne.s32.totalorder %s29_s15, %s718_s5  ;;  %p724_p7 = scmp.lt.s32.totalorder %s718_s5, %s718_s5 }
  0x30   :  { %p725_p8 = por %p724_p7, %p723_p6 }
  0x32   :  { %p726_p9 = pnand %p725_p8, %p719_p5 }
  0x34   :  { %729 = shalt.err (!%p726_p9)
}
  0x35   :  { %31 = dma.hbm_to_vmem [thread:$0]  %s1061_s1, 128, %s29_s15, [#allocation3]  }
  0x36   :  { %s730_s28 = scalar_lea.hbm %s1064_s4, 4096 }
  0x37   :  { %p731_p10 = scmp.ne.s32.totalorder %s1064_s4, %s730_s28  ;;  %p734_p11 = scmp.lt.u32.totalorder %s730_s28, %s1064_s4 }
  0x39   :  { %p736_p12 = pnand %p734_p11, %p731_p10 }
  0x3b   :  { %739 = shalt.err (!%p736_p12)
}
  0x3c   :  { %s740_s14 = scalar_lea.vmem %s950_s17, 4096  ;;  %p745_p0 = scmp.lt.s32.totalorder %s950_s17, %s950_s17 }
  0x3d   :  { %p741_p13 = scmp.ne.s32.totalorder %s950_s17, %s740_s14  ;;  %p746_p1 = scmp.lt.s32.totalorder %s740_s14, %s740_s14 }
  0x3f   :  { %p747_p2 = por %p746_p1, %p745_p0 }
  0x41   :  { %p748_p3 = pnand %p747_p2, %p741_p13 }
  0x43   :  { %751 = shalt.err (!%p748_p3)
}
  0x44   :  { %s856_s1 = smov 256   ;;  %s857_s15 = smov 16  }
  0x45   :  { %55 = dma.hbm_to_vmem [thread:$0]  %s1064_s4, 4096, %s950_s17, [#allocation6], %s856_s1, %s856_s1, %s857_s15  }
  0x46   :  { %s858_s19 = smov [#allocation10]   ;;  %s752_s23 = scalar_lea.hbm %s1066_s6, 2048 }
  0x47   :  { %s73_s20 = sshll.u32 %s858_s19, 4  ;;  %p753_p4 = scmp.ne.s32.totalorder %s1066_s6, %s752_s23  ;;  %s74_s20 = int_to_ptr.vmem [resolvable:$true] %s73_s20 }
  0x48   :  { %p756_p5 = scmp.lt.u32.totalorder %s752_s23, %s1066_s6 }
  0x4a   :  { %p758_p6 = pnand %p756_p5, %p753_p4 }
  0x4c   :  { %761 = shalt.err (!%p758_p6)
}
  0x4d   :  { %s762_s26 = scalar_lea.vmem %s74_s20, 2048  ;;  %p767_p8 = scmp.lt.s32.totalorder %s74_s20, %s74_s20 }
  0x4e   :  { %p763_p7 = scmp.ne.s32.totalorder %s74_s20, %s762_s26  ;;  %p768_p9 = scmp.lt.s32.totalorder %s762_s26, %s762_s26 }
  0x50   :  { %p769_p10 = por %p768_p9, %p767_p8 }
  0x52   :  { %p770_p11 = pnand %p769_p10, %p763_p7 }
  0x54   :  { %773 = shalt.err (!%p770_p11)
}
  0x55   :  { %79 = dma.hbm_to_vmem [thread:$0]  %s1066_s6, 2048, %s74_s20, [#allocation9], %s852_s3, %s852_s3, %s853_s10  }
  0x56   :  { %840 = dma.done.wait [#allocation3], 128  }
  0x57   :  { %841 = vsyncadd [#allocation3], 4294967168 }
  0x58   :  { %842 = dma.done.wait [#allocation6], 4352  }
  0x59   :  { %843 = vsyncadd [#allocation6], 4294962944 }
  0x5a   :  { %844 = dma.done.wait [#allocation9], 4096  }
  0x5b   :  { %845 = vsyncadd [#allocation9], 4294963200  ;;  %v859_v0 = vmov 0   ;;  %v103_v1 = vld [vmem:[%s1060_s0] sm:$0xff]  ;;  %v117_v2 = vld [vmem:[#allocation7 + $0x8] sm:$0xff]  ;;  %v860_v21 = vmov 0.0  }
  0x5c   :  { %661 = vset.pattern.permute.xlu0 %v859_v0  ;;  %v119_v3 = vld [vmem:[#allocation7 + $0x18] sm:$0xff]  ;;  %v116_v5 = vld [vmem:[#allocation7] sm:$0xff]  ;;  %v118_v6 = vld [vmem:[#allocation7 + $0x10] sm:$0xff]  ;;  %223 = vmatprep.mubr.f32.mxu0 %v860_v21  ;;  %v861_v28 = vmov 0.0|0.0   ;;  %vm862_vm0 = vmmov 0   ;;  %s863_s29 = smov [#allocation12]  }
  0x5d   :  { %106 = vperm.xlu0 %661, %v103_v1   ;;  %v565_v4 = vpack.c.bf16 %v119_v3, %v117_v2  ;;  %v121_v7 = vld [vmem:[#allocation7 + $0x28] sm:$0xff]  ;;  %v567_v8 = vpack.c.bf16 %v118_v6, %v116_v5  ;;  %v123_v9 = vld [vmem:[#allocation7 + $0x38] sm:$0xff]  ;;  %v120_v10 = vld [vmem:[#allocation7 + $0x20] sm:$0xff]  ;;  %597 = vmatprep.subr.bf16.mxu1 %v861_v28  ;;  %s433_s30 = sshll.u32 %s863_s29, 4  ;;  %s434_s30 = int_to_ptr.vmem [resolvable:$true] %s433_s30 }
  0x5e   :  { %v122_v11 = vld [vmem:[#allocation7 + $0x30] sm:$0xff]  ;;  %v569_v12 = vpack.c.bf16 %v123_v9, %v121_v7  ;;  %v125_v13 = vld [vmem:[#allocation7 + $0x48] sm:$0xff]  ;;  %v127_v14 = vld [vmem:[#allocation7 + $0x58] sm:$0xff]  ;;  %527 = vmatprep.mubr.msk.f32.mxu1 %vm862_vm0, %v860_v21  ;;  %s774_s11 = scalar_lea.vmem %s434_s30, 256  ;;  %p779_p13 = scmp.lt.s32.totalorder %s434_s30, %s434_s30 }
  0x5f   :  { %566 = vmatprep.subr.bf16.mxu0 %v565_v4  ;;  %v571_v15 = vpack.c.bf16 %v122_v11, %v120_v10  ;;  %v573_v16 = vpack.c.bf16 %v127_v14, %v125_v13  ;;  %v124_v17 = vld [vmem:[#allocation7 + $0x40] sm:$0xff]  ;;  %v126_v18 = vld [vmem:[#allocation7 + $0x50] sm:$0xff]  ;;  %v129_v19 = vld [vmem:[#allocation7 + $0x68] sm:$0xff]  ;;  %p775_p12 = scmp.ne.s32.totalorder %s434_s30, %s774_s11  ;;  %p780_p0 = scmp.lt.s32.totalorder %s774_s11, %s774_s11 }
  0x60   :  { %568 = vmatpush1.bf16.msra.mxu0 %v567_v8  ;;  %v131_v20 = vld [vmem:[#allocation7 + $0x78] sm:$0xff]  ;;  %v575_v22 = vpack.c.bf16 %v126_v18, %v124_v17  ;;  %v128_v24 = vld [vmem:[#allocation7 + $0x60] sm:$0xff]  ;;  %v130_v25 = vld [vmem:[#allocation7 + $0x70] sm:$0xff] }
  0x61   :  { %570 = vmatprep.subr.bf16.mxu0 %v569_v12  ;;  %v577_v23 = vpack.c.bf16 %v131_v20, %v129_v19  ;;  %v133_v26 = vld [vmem:[#allocation7 + $0x88] sm:$0xff]  ;;  %v135_v27 = vld [vmem:[#allocation7 + $0x98] sm:$0xff]  ;;  %v579_v29 = vpack.c.bf16 %v130_v25, %v128_v24  ;;  %v132_v30 = vld [vmem:[#allocation7 + $0x80] sm:$0xff]  ;;  %p781_p1 = por %p780_p0, %p779_p13 }
  0x62   :  { %v134_v31 = vld [vmem:[#allocation7 + $0x90] sm:$0xff]  ;;  %v237_v32 = vld [vmem:[#allocation8] sm:$0xff]  ;;  %v581_v33 = vpack.c.bf16 %v135_v27, %v133_v26  ;;  %v238_v34 = vld [vmem:[#allocation8 + $0x8] sm:$0xff] }
  0x63   :  { %v239_v35 = vld [vmem:[#allocation8 + $0x10] sm:$0xff]  ;;  %v240_v36 = vld [vmem:[#allocation8 + $0x18] sm:$0xff]  ;;  %v137_v37 = vld [vmem:[#allocation7 + $0xa8] sm:$0xff]  ;;  %v598_v39 = vpack.c.bf16 %v238_v34, %v237_v32  ;;  %v583_v40 = vpack.c.bf16 %v134_v31, %v132_v30  ;;  %p782_p2 = pnand %p781_p1, %p775_p12 }
  0x64   :  { %572 = vmatpush1.bf16.msra.mxu0 %v571_v15  ;;  %v139_v38 = vld [vmem:[#allocation7 + $0xb8] sm:$0xff]  ;;  %v601_v41 = vpack.c.bf16 %v240_v36, %v239_v35  ;;  %v136_v43 = vld [vmem:[#allocation7 + $0xa0] sm:$0xff]  ;;  %v138_v44 = vld [vmem:[#allocation7 + $0xb0] sm:$0xff] }
  0x65   :  { %574 = vmatprep.subr.bf16.mxu0 %v573_v16  ;;  %599 = vmatpush3.bf16.msra.mxu1 %v598_v39  ;;  %v585_v42 = vpack.c.bf16 %v139_v38, %v137_v37  ;;  %v141_v45 = vld [vmem:[#allocation7 + $0xc8] sm:$0xff]  ;;  %v143_v46 = vld [vmem:[#allocation7 + $0xd8] sm:$0xff]  ;;  %v587_v47 = vpack.c.bf16 %v138_v44, %v136_v43  ;;  %v140_v49 = vld [vmem:[#allocation7 + $0xc0] sm:$0xff]  ;;  %v149_v43 = vlaneseq }
  0x66   :  { %600 = vmatprep.subr.bf16.mxu1 %v861_v28  ;;  %v589_v48 = vpack.c.bf16 %v143_v46, %v141_v45  ;;  %v142_v50 = vld [vmem:[#allocation7 + $0xd0] sm:$0xff]  ;;  %v145_v51 = vld [vmem:[#allocation7 + $0xe8] sm:$0xff]  ;;  %v147_v52 = vld [vmem:[#allocation7 + $0xf8] sm:$0xff] }
  0x67   :  { %v591_v53 = vpack.c.bf16 %v142_v50, %v140_v49  ;;  %v593_v54 = vpack.c.bf16 %v147_v52, %v145_v51  ;;  %v144_v55 = vld [vmem:[#allocation7 + $0xe0] sm:$0xff]  ;;  %v146_v56 = vld [vmem:[#allocation7 + $0xf0] sm:$0xff]  ;;  %v113_v1 = vld [vmem:[%s1062_s2] sm:$0xff]  ;;  %v150_v44 = vshrl.u32 %v149_v43, 7 }
  0x68   :  { %576 = vmatpush1.bf16.msra.mxu0 %v575_v22  ;;  %v595_v57 = vpack.c.bf16 %v146_v56, %v144_v55  ;;  %v95_v58 = vld [vmem:[#allocation5] ss:$0 sm:$0xff]  ;;  %v97_v59 = vld [vmem:[#allocation5 + $0x2] ss:$0 sm:$0xff]  ;;  %v96_v61 = vld [vmem:[#allocation5 + $0x1] ss:$0 sm:$0xff] }
  0x69   :  { %578 = vmatprep.subr.bf16.mxu0 %v577_v23  ;;  %602 = vmatpush3.bf16.msra.mxu1 %v601_v41  ;;  %v98_v62 = vld [vmem:[#allocation5 + $0x3] ss:$0 sm:$0xff]  ;;  %v241_v6 = vld [vmem:[#allocation8 + $0x20] sm:$0xff]  ;;  %v242_v7 = vld [vmem:[#allocation8 + $0x28] sm:$0xff]  ;;  %v151_v45 = vsub.s32 0, %v150_v44 }
  0x6a   :  { %603 = vmatprep.subr.bf16.mxu1 %v861_v28  ;;  %v604_v8 = vpack.c.bf16 %v242_v7, %v241_v6  ;;  %v243_v9 = vld [vmem:[#allocation8 + $0x30] sm:$0xff]  ;;  %v244_v10 = vld [vmem:[#allocation8 + $0x38] sm:$0xff]  ;;  %v245_v12 = vld [vmem:[#allocation8 + $0x40] sm:$0xff] }
  0x6b   :  { %v607_v11 = vpack.c.bf16 %v244_v10, %v243_v9  ;;  %v246_v13 = vld [vmem:[#allocation8 + $0x48] sm:$0xff]  ;;  %v247_v15 = vld [vmem:[#allocation8 + $0x50] sm:$0xff]  ;;  %v248_v16 = vld [vmem:[#allocation8 + $0x58] sm:$0xff] }
  0x6c   :  { %580 = vmatpush1.bf16.msra.mxu0 %v579_v29  ;;  %v610_v14 = vpack.c.bf16 %v246_v13, %v245_v12  ;;  %v613_v17 = vpack.c.bf16 %v248_v16, %v247_v15  ;;  %v249_v18 = vld [vmem:[#allocation8 + $0x60] sm:$0xff]  ;;  %v250_v19 = vld [vmem:[#allocation8 + $0x68] sm:$0xff]  ;;  %v251_v22 = vld [vmem:[#allocation8 + $0x70] sm:$0xff] }
  0x6d   :  { %582 = vmatprep.subr.bf16.mxu0 %v581_v33  ;;  %605 = vmatpush3.bf16.msra.mxu1 %v604_v8  ;;  %v616_v20 = vpack.c.bf16 %v250_v19, %v249_v18  ;;  %v252_v23 = vld [vmem:[#allocation8 + $0x78] sm:$0xff]  ;;  %v326_v25 = vld [vmem:[#allocation10] sm:$0xff]  ;;  %v327_v26 = vld [vmem:[#allocation10 + $0x8] sm:$0xff] }
  0x6e   :  { %606 = vmatprep.subr.bf16.mxu1 %v861_v28  ;;  %v619_v24 = vpack.c.bf16 %v252_v23, %v251_v22  ;;  %v328_v27 = vld [vmem:[#allocation10 + $0x10] sm:$0xff]  ;;  %v622_v29 = vpack.c.bf16 %v327_v26, %v326_v25  ;;  %v329_v30 = vld [vmem:[#allocation10 + $0x18] sm:$0xff]  ;;  %v331_v32 = vld [vmem:[#allocation10 + $0x28] sm:$0xff] }
  0x6f   :  { %v625_v31 = vpack.c.bf16 %v329_v30, %v328_v27  ;;  %v332_v34 = vld [vmem:[#allocation10 + $0x30] sm:$0xff]  ;;  %v333_v35 = vld [vmem:[#allocation10 + $0x38] sm:$0xff]  ;;  %v334_v37 = vld [vmem:[#allocation10 + $0x40] sm:$0xff] }
  0x70   :  { %584 = vmatpush1.bf16.msra.mxu0 %v583_v40  ;;  %v631_v36 = vpack.c.bf16 %v333_v35, %v332_v34  ;;  %v335_v38 = vld [vmem:[#allocation10 + $0x48] sm:$0xff]  ;;  %v336_v40 = vld [vmem:[#allocation10 + $0x50] sm:$0xff]  ;;  %v337_v41 = vld [vmem:[#allocation10 + $0x58] sm:$0xff] }
  0x71   :  { %586 = vmatprep.subr.bf16.mxu0 %v585_v42  ;;  %608 = vmatpush3.bf16.msra.mxu1 %v607_v11  ;;  %v634_v39 = vpack.c.bf16 %v335_v38, %v334_v37  ;;  %v637_v42 = vpack.c.bf16 %v337_v41, %v336_v40  ;;  %v100_v46 = vld [vmem:[#allocation5 + $0x4] ss:$8 sm:$0x3]  ;;  %v233_v56 = vld [vmem:[#allocation2] sm:$0xff] }
  0x72   :  { %609 = vmatprep.subr.bf16.mxu1 %v861_v28 }
  0x74   :  { %588 = vmatpush1.bf16.msra.mxu0 %v587_v47  ;;  %v155_v47 = vsub.s32 1, %v150_v44 }
  0x75   :  { %590 = vmatprep.subr.bf16.mxu0 %v589_v48  ;;  %611 = vmatpush3.bf16.msra.mxu1 %v610_v14  ;;  %v152_v48 = vrot.slane %v100_v46, %v151_v45 }
  0x76   :  { %612 = vmatprep.subr.bf16.mxu1 %v861_v28  ;;  %v156_v49 = vrot.slane %v100_v46, %v155_v47 }
  0x78   :  { %592 = vmatpush1.bf16.msra.mxu0 %v591_v53 }
  0x79   :  { %594 = vmatprep.subr.bf16.mxu0 %v593_v54  ;;  %614 = vmatpush3.bf16.msra.mxu1 %v613_v17 }
  0x7a   :  { %615 = vmatprep.subr.bf16.mxu1 %v861_v28 }
  0x7c   :  { %596 = vmatpush1.bf16.msra.mxu0 %v595_v57 }
  0x7d   :  { %621 = vmatprep.subr.bf16.mxu0 %v861_v28  ;;  %617 = vmatpush3.bf16.msra.mxu1 %v616_v20 }
  0x7e   :  { %618 = vmatprep.subr.bf16.mxu1 %v861_v28 }
  0x81   :  { %620 = vmatpush3.bf16.msra.mxu1 %v619_v24 }
  0xdc   :  { %v107_v60 = vpop.permute.xlu0 %106 }
  0xdd   :  { %v109_v63 = vmul.f32 %v107_v60, %v95_v58  ;;  %v111_v0 = vmul.f32 %v107_v60, %v97_v59  ;;  %v338_v60 = vld [vmem:[#allocation10 + $0x60] sm:$0xff] }
  0xdf   :  { %v110_v2 = vadd.f32 %v109_v63, %v96_v61  ;;  %v112_v3 = vadd.f32 %v111_v0, %v98_v62  ;;  %v339_v61 = vld [vmem:[#allocation10 + $0x68] sm:$0xff]  ;;  %v340_v63 = vld [vmem:[#allocation10 + $0x70] sm:$0xff]  ;;  %v341_v0 = vld [vmem:[#allocation10 + $0x78] sm:$0xff] }
  0xe0   :  { %v640_v62 = vpack.c.bf16 %v339_v61, %v338_v60 }
  0xe1   :  { %412 = vst [vmem:[#allocation11] sm:$0xff] %v110_v2  ;;  %v114_v4 = vadd.f32 %v113_v1, %v112_v3  ;;  %v643_v1 = vpack.c.bf16 %v341_v0, %v340_v63  ;;  %v236_v2 = vld [vmem:[%s1062_s2 + $0x8] sm:$0xff]  ;;  %v101_v3 = vld [vmem:[#allocation5 + $0x5] ss:$0 sm:$0xff] }
  0xe3   :  { %v115_v5 = vmax.f32 %v114_v4, 0.0 }
  0xe5   :  { %224 = vmatmul.mubr.f32.vlgmr.msra.gmra.mrb[0].mxu0 %v115_v5 }
  0xe6   :  { %562 = vmatprep.mubr.msk.f32.mxu0 %vm862_vm0, %v860_v21  ;;  %623 = vmatpush3.bf16.msra.mxu0 %v622_v29  ;;  %v330_v21 = vld [vmem:[#allocation10 + $0x20] sm:$0xff] }
  0xe7   :  { %624 = vmatprep.subr.bf16.mxu0 %v861_v28  ;;  %v628_v33 = vpack.c.bf16 %v331_v32, %v330_v21 }
  0xea   :  { %626 = vmatpush3.bf16.msra.mxu0 %v625_v31 }
  0xeb   :  { %627 = vmatprep.subr.bf16.mxu0 %v861_v28 }
  0xee   :  { %629 = vmatpush3.bf16.msra.mxu0 %v628_v33 }
  0xef   :  { %630 = vmatprep.subr.bf16.mxu0 %v861_v28 }
  0xf2   :  { %632 = vmatpush3.bf16.msra.mxu0 %v631_v36 }
  0xf3   :  { %633 = vmatprep.subr.bf16.mxu0 %v861_v28 }
  0xf6   :  { %635 = vmatpush3.bf16.msra.mxu0 %v634_v39 }
  0xf7   :  { %636 = vmatprep.subr.bf16.mxu0 %v861_v28 }
  0xfa   :  { %638 = vmatpush3.bf16.msra.mxu0 %v637_v42 }
  0xfb   :  { %639 = vmatprep.subr.bf16.mxu0 %v861_v28 }
  0xfe   :  { %641 = vmatpush3.bf16.msra.mxu0 %v640_v62 }
  0xff   :  { %642 = vmatprep.subr.bf16.mxu0 %v861_v28 }
 0x102   :  { %644 = vmatpush3.bf16.msra.mxu0 %v643_v1 }
 0x1b8   :  { %v225_v50 = vpop.f32.mrb[0].mxu0 }
 0x1b9   :  { %v226_v51 = vadd.f32 %v225_v50, %v152_v48  ;;  %v227_v52 = vpop.f32.mrb[1].mxu0 }
 0x1ba   :  { %v228_v53 = vadd.f32 %v227_v52, %v156_v49 }
 0x1bb   :  { %414 = vst [vmem:[#allocation12] sm:$0xff] %v226_v51 }
 0x1bc   :  { %v230_v54 = vmul.f32 0.5, %v228_v53  ;;  %415 = vst [vmem:[#allocation12 + $0x8] sm:$0xff] %v228_v53 }
 0x1be   :  { %v231_v55 = vmul.f32 1.442695, %v230_v54 }
 0x1c0   :  { %662 = vpow2.f32 %v231_v55 }
 0x1ca   :  { %v663_v57 = vpop.eup %662 }
 0x1cb   :  { %v234_v58 = vmul.f32 %v663_v57, %v233_v56 }
 0x1cd   :  { %v235_v59 = vadd.f32 %v234_v58, %v226_v51 }
 0x1cf   :  { %528 = vmatmul.mubr.f32.vlgmr.msra.gmra.mrb[0].mxu1 %v235_v59  ;;  %416 = vst [vmem:[#allocation14] sm:$0xff] %v235_v59 }
 0x2a2   :  { %v319_v4 = vpop.f32.mrb[0].mxu1 }
 0x2a3   :  { %v323_v5 = vadd.f32 %v319_v4, %v236_v2  ;;  %v529_v6 = vpop.f32.mrb[1].mxu1 }
 0x2a5   :  { %v324_v7 = vadd.f32 %v323_v5, %v101_v3 }
 0x2a7   :  { %v325_v8 = vmax.f32 %v324_v7, 0.0 }
 0x2a9   :  { %563 = vmatmul.mubr.f32.vlgmr.msra.gmra.mrb[2].mxu0 %v325_v8 }
 0x2aa   :  { %785 = shalt.err (!%p782_p2)
}
 0x2ab   :  { %s786_s2 = scalar_lea.hbm %s1068_s8, 256 }
 0x2ac   :  { %p787_p3 = scmp.ne.s32.totalorder %s1068_s8, %s786_s2  ;;  %p790_p4 = scmp.lt.u32.totalorder %s786_s2, %s1068_s8 }
 0x2ae   :  { %p792_p5 = pnand %p790_p4, %p787_p3 }
 0x2b0   :  { %795 = shalt.err (!%p792_p5)
}
 0x2b1   :  { %436 = dma.vmem_to_hbm [thread:$0]  %s434_s30, 256, %s1068_s8, [#allocation13]  }
 0x2b2   :  { %s864_s21 = smov [#allocation14]  }
 0x2b3   :  { %s443_s22 = sshll.u32 %s864_s21, 4  ;;  %s444_s22 = int_to_ptr.vmem [resolvable:$true] %s443_s22 }
 0x2b4   :  { %s796_s23 = scalar_lea.vmem %s444_s22, 128  ;;  %p801_p7 = scmp.lt.s32.totalorder %s444_s22, %s444_s22 }
 0x2b5   :  { %p797_p6 = scmp.ne.s32.totalorder %s444_s22, %s796_s23  ;;  %p802_p8 = scmp.lt.s32.totalorder %s796_s23, %s796_s23 }
 0x2b7   :  { %p803_p9 = por %p802_p8, %p801_p7 }
 0x2b9   :  { %p804_p10 = pnand %p803_p9, %p797_p6 }
 0x2bb   :  { %807 = shalt.err (!%p804_p10)
}
 0x2bc   :  { %s808_s12 = scalar_lea.hbm %s1069_s9, 128 }
 0x2bd   :  { %p809_p11 = scmp.ne.s32.totalorder %s1069_s9, %s808_s12  ;;  %p812_p12 = scmp.lt.u32.totalorder %s808_s12, %s1069_s9 }
 0x2bf   :  { %p814_p13 = pnand %p812_p12, %p809_p11 }
 0x2c1   :  { %817 = shalt.err (!%p814_p13)
}
 0x2c2   :  { %446 = dma.vmem_to_hbm [thread:$0]  %s444_s22, 128, %s1069_s9, [#allocation13]   ;;  %v102_v28 = vld [vmem:[#allocation5 + $0x6] ss:$0 sm:$0xff] }
 0x2c3   :  { %s865_s28 = smov [#allocation11]  }
 0x2c4   :  { %s423_s0 = sshll.u32 %s865_s28, 4  ;;  %s424_s0 = int_to_ptr.vmem [resolvable:$true] %s423_s0 }
 0x2c5   :  { %s818_s6 = scalar_lea.vmem %s424_s0, 256  ;;  %p823_p1 = scmp.lt.s32.totalorder %s424_s0, %s424_s0 }
 0x2c6   :  { %p819_p0 = scmp.ne.s32.totalorder %s424_s0, %s818_s6  ;;  %p824_p2 = scmp.lt.s32.totalorder %s818_s6, %s818_s6 }
 0x2c8   :  { %p825_p3 = por %p824_p2, %p823_p1 }
 0x2ca   :  { %p826_p4 = pnand %p825_p3, %p819_p0 }
 0x37c   :  { %v408_v9 = vpop.f32.mrb[2].mxu0 }
 0x37d   :  { %v409_v10 = vadd.f32 %v408_v9, %v102_v28  ;;  %v564_v11 = vpop.f32.mrb[3].mxu0 }
 0x37f   :  { %413 = vst [vmem:[#allocation11 + $0x8] sm:$0xff] %v409_v10 }
 0x380   :  { %829 = shalt.err (!%p826_p4)
}
 0x381   :  { %s830_s29 = scalar_lea.hbm %s1067_s7, 256 }
 0x382   :  { %p831_p5 = scmp.ne.s32.totalorder %s1067_s7, %s830_s29  ;;  %p834_p6 = scmp.lt.u32.totalorder %s830_s29, %s1067_s7 }
 0x384   :  { %p836_p7 = pnand %p834_p6, %p831_p5 }
 0x386   :  { %839 = shalt.err (!%p836_p7)
}
 0x387   :  { %426 = dma.vmem_to_hbm [thread:$0]  %s424_s0, 256, %s1067_s7, [#allocation4]  }
 0x388   :  { %846 = dma.done.wait [#allocation4], 256  }
 0x389   :  { %847 = vsyncadd [#allocation4], 4294967040 }
 0x38a   :  { %848 = dma.done.wait [#allocation13], 384  }
 0x38b   :  { %849 = vsyncadd [#allocation13], 4294966912 }
 0x38c   :  { %456 = vsyncpa [#allocation3], 1 }
 0x38d   :  { %457 = vsyncpa [#allocation6], 1 }
 0x38e   :  { %458 = vsyncpa [#allocation9], 1 }
 0x38f   :  { %459 = vsyncpa [#allocation4], 1 }
 0x390   :  { %460 = vsyncpa [#allocation13], 1 }

</bundles_post_ra>
